<compile_context>
chip_gen: v5e
topology: v5e:2x2
jax: 0.10.0
libtpu: 0.0.40
codegen_flags: <defaults>
</compile_context>

<pallas_src>
import jax
import jax.numpy as jnp
from jax.experimental import pallas as pl
from jax.experimental.pallas import tpu as pltpu

LANES = 128
_MAX_TILE_BYTES = 8 << 20  # 8 MiB per block; 4x (dbl-buffered in+out) = 32 MiB


def _sigmoid_kernel(x_ref, o_ref):
    # Load, upcast to f32, sigmoid (lowers to the EUP logistic path), store.
    x = x_ref[...].astype(jnp.float32)
    o_ref[...] = jax.nn.sigmoid(x).astype(o_ref.dtype)


def _round_up(a: int, b: int) -> int:
    return -(-a // b) * b


def _run_2d(x2d: jax.Array, tile_rows: int) -> jax.Array:
    n_rows, lanes = x2d.shape
    grid = (pl.cdiv(n_rows, tile_rows),)
    tile_bytes = tile_rows * lanes * jnp.dtype(x2d.dtype).itemsize
    # VMEM budget: 2 buffers x (in + out) tiles plus headroom, capped for v7x.
    vmem_limit = min(48 << 20, max(16 << 20, 6 * tile_bytes))
    return pl.pallas_call(
        _sigmoid_kernel,
        out_shape=jax.ShapeDtypeStruct((n_rows, lanes), x2d.dtype),
        grid_spec=pltpu.PrefetchScalarGridSpec(
            num_scalar_prefetch=0,
            grid=grid,
            in_specs=[pl.BlockSpec((tile_rows, lanes), lambda i: (i, 0))],
            out_specs=pl.BlockSpec((tile_rows, lanes), lambda i: (i, 0)),
        ),
        compiler_params=pltpu.CompilerParams(
            dimension_semantics=("parallel",),
            vmem_limit_bytes=vmem_limit,
        ),
    )(x2d)


def _pick_tile_rows(n_rows: int, sub_mult: int, itemsize: int) -> int:
    max_tile_rows = max(sub_mult, _MAX_TILE_BYTES // (LANES * itemsize))
    if n_rows > max_tile_rows:
        return max_tile_rows
    if n_rows >= 2 * sub_mult:
        # Split into >=2 blocks so both v7x TensorCores get work.
        return _round_up(pl.cdiv(n_rows, 2), sub_mult)
    # Tiny input: single block equal to the full array dim (always legal).
    return n_rows


def sigm(x: jax.Array) -> jax.Array:
    """Elementwise sigmoid matching torch.nn.Sigmoid (float dtypes).

    Note: like torch.nn.Sigmoid, integer inputs are not supported.
    """
    orig_shape = x.shape
    orig_dtype = x.dtype
    total = x.size
    if total == 0:
        return x

    itemsize = jnp.dtype(orig_dtype).itemsize
    sub_mult = max(8, 32 // itemsize)  # f32: 8, bf16: 16, int8/fp8: 32

    x_flat = x.reshape(-1)
    rem = total % LANES

    if rem == 0:
        # Common (NCHW) case: zero-copy reshape, no padding, no output slice.
        n_rows = total // LANES
        x2d = x_flat.reshape(n_rows, LANES)
        tile_rows = _pick_tile_rows(n_rows, sub_mult, itemsize)
        out2d = _run_2d(x2d, tile_rows)
        return out2d.reshape(orig_shape)

    # Rare path: total not a multiple of 128 — pad the tail once, slice once.
    pad = LANES - rem
    x_flat = jnp.concatenate([x_flat, jnp.zeros((pad,), dtype=orig_dtype)])
    n_rows = (total + pad) // LANES
    x2d = x_flat.reshape(n_rows, LANES)
    tile_rows = _pick_tile_rows(n_rows, sub_mult, itemsize)
    out2d = _run_2d(x2d, tile_rows)
    return out2d.reshape(-1)[:total].reshape(orig_shape)


if __name__ == "__main__":
    key = jax.random.PRNGKey(0)
    # Small NCHW input consistent with a conv-style tensor.
    x = jax.random.normal(key, (2, 4, 16, 16), dtype=jnp.float32)

    y = sigm(x)
    jax.block_until_ready(y)

    # Sanity check against pure-JAX reference.
    y_ref = jax.nn.sigmoid(x)
    assert y.shape == x.shape and y.dtype == x.dtype
    assert jnp.allclose(y, y_ref, atol=1e-6, rtol=1e-6)

    print("KERNEL_OK")
</pallas_src>

<mosaic_0001>
module attributes {stable_mosaic.version = 11 : i64} {
  func.func @_sigmoid_kernel(%arg0: i32, %arg1: memref<8x128xf32, #tpu.memory_space<vmem>>, %arg2: memref<8x128xf32, #tpu.memory_space<vmem>>) attributes {dimension_semantics = [#tpu.dimension_semantics<parallel>], iteration_bounds = array<i64: 2>, scalar_prefetch = 0 : i64, scratch_operands = 0 : i64, tpu.core_type = #tpu.core_type<tc>, window_params = [{transform_indices = @transform_0, window_bounds = array<i64: 8, 128>}, {transform_indices = @transform_1, window_bounds = array<i64: 8, 128>}]} {
    %c0 = arith.constant 0 : index
    %c0_0 = arith.constant 0 : index
    %0 = vector.load %arg1[%c0, %c0_0] : memref<8x128xf32, #tpu.memory_space<vmem>>, vector<8x128xf32>
    %1 = arith.negf %0 : vector<8x128xf32>
    %2 = math.exp %1 : vector<8x128xf32>
    %cst = arith.constant 1.000000e+00 : f32
    %3 = vector.broadcast %cst : f32 to vector<8x128xf32>
    %4 = arith.addf %3, %2 : vector<8x128xf32>
    %5 = arith.divf %3, %4 : vector<8x128xf32>
    %c0_1 = arith.constant 0 : index
    %c0_2 = arith.constant 0 : index
    %6 = vector.load %arg2[%c0_1, %c0_2] : memref<8x128xf32, #tpu.memory_space<vmem>>, vector<8x128xf32>
    tpu.vector_store %arg2[%c0_1, %c0_2], %5 {strides = array<i32>} : memref<8x128xf32, #tpu.memory_space<vmem>>, vector<8x128xf32>,
    return
  }
  func.func @transform_0(%arg0: i32) -> (i32, i32) {
    %c0_i32 = arith.constant 0 : i32
    %c0_i32_0 = arith.constant 0 : i32
    return %arg0, %c0_i32 : i32, i32
  }
  func.func @transform_1(%arg0: i32) -> (i32, i32) {
    %c0_i32 = arith.constant 0 : i32
    %c0_i32_0 = arith.constant 0 : i32
    return %arg0, %c0_i32 : i32, i32
  }
}

</mosaic_0001>

<bundles_post_ra>
// kernel: tpu_custom_call.1
= control target key start
LH: loop header
LB: loop body
LE: loop exit
PB: predicated region body
PF: predicated region fallthrough
CT: control target
= control target key end

     0   :  { %6 = vsyncpa [#allocation3], 0  ;;  %s539_s0 = inlined_call_operand.hbm [shape: f32[16,128], index: 0, kind: input, shape index: {}]   ;;  %s540_s1 = inlined_call_operand.hbm [shape: f32[16,128], index: 1, kind: output, shape index: {}]  }
   0x1   :  { %8 = vsyncpa [#allocation3 + $0x1], 0 }
   0x2   :  { %9 = vsyncpa [#allocation4], 0 }
   0x3   :  { %11 = vsyncpa [#allocation4 + $0x1], 0  ;;  %s412_s6 = smov 0   ;;  %s414_s7 = smov 0  }
   0x4   :  { %s416_s8 = smov 0   ;;  %s418_s9 = smov 0  }
   0x5 LB: > { %s433_s10 = sadd.s32 4294967295, %s400_s9   ;;  %s241_s11 = sadd.s32 4294967294, %s400_s9   ;;  %s400_s9 = sphi %s418_s9, %s550_s9   ;;  %s396_s8 = sphi %s416_s8, %s549_s8   ;;  %s392_s7 = sphi %s414_s7, %s548_s7   ;;  %s388_s6 = sphi %s412_s6, %s547_s6  }
   0x6   : > { %s437_s12 = sadd.s32 1, %s400_s9   ;;  %s24_s13 = sadd.s32 1, %s396_s8 }
   0x7   : > { %s21_s14 = ssub.s32 %s400_s9, %s437_s12  ;;  %p31_p0 = scmp.ne.s32.totalorder %s396_s8, %s392_s7 }
   0x8   : > { %p22_p1 = scmp.eq.s32.totalorder %s21_s14, 0  ;;  %p32_p2 = scmp.eq.s32.totalorder %s400_s9, 0 }
   0x9   : > { %p37_p3 = scmp.ne.s32.totalorder %s392_s7, %s388_s6  ;;  %p38_p4 = scmp.eq.s32.totalorder %s433_s10, 0 }
   0xa   : > { %s449_s15 = scalar_select %p22_p1, %s396_s8, %s24_s13  }
   0xb   : > { %p451_p5 = por %p32_p2, %p31_p0  ;;  %p455_p6 = por %p38_p4, %p37_p3 }
   0xc   : > { %p61_p7 = scmp.eq.s32.totalorder %s433_s10, 1  ;;  %p67_p8 = scmp.eq.s32.totalorder %s241_s11, 1 }
   0xd   : > { %p266_p10 = scmp.lt.s32.totalorder %s400_s9, 2  ;;  %s87_s20 = sand.u32 1, %s396_s8  }
   0xe   : > { %p462_p11 = por %p61_p7, %p31_p0  ;;  %p466_p12 = por %p67_p8, %p37_p3 }
   0xf   : > { %s245_s21 = sshll.u32 %s400_s9, 3  ;;  %s244_s22 = sshll.u32 %s87_s20, 3 }
  0x10   : > { %s95_s25 = scalar_lea.hbm %s539_s0, %s245_s21  ;;  %s91_s27 = scalar_lea.vmem [#allocation2], %s244_s22 }
  0x11   : > { %s97_s26 = sshll.u32 %s95_s25, 4  ;;  %s99_s28 = sshll.u32 %s91_s27, 4  ;;  %s98_s26 = int_to_ptr.hbm [resolvable:$true] %s97_s26  ;;  %s100_s28 = int_to_ptr.vmem [resolvable:$true] %s99_s28 }
  0x12   : > { %p477_p13 = pnand %p266_p10, %p451_p5  ;;  %p246_p0 = scmp.ge.s32.totalorder %s400_s9, 1 }
  0x13   : > { %p104_p1 = scmp.lt.s32.totalorder %s400_s9, 3  ;;  %s88_s30 = scalar_lea.sflag [#allocation3], %s87_s20 }
  0x14   : > { %s304_s2 = sshra.s32 %s98_s26, 4  ;;  %p308_p3 = pneg %p477_p13  ;;  %s305_s2 = int_to_ptr.hbm [resolvable:$true] %s304_s2 }
  0x15   : > { %s306_s3 = scalar_lea.hbm %s305_s2, 8  ;;  %s311_s11 = scalar_lea.hbm %s539_s0, 16 }
  0x16   : > { %p307_p2 = scmp.ne.s32.totalorder %s305_s2, %s306_s3  ;;  %p312_p5 = scmp.lt.s32.totalorder %s305_s2, %s539_s0 }
  0x17   : > { %p313_p8 = scmp.lt.s32.totalorder %s311_s11, %s306_s3 }
  0x18   : > { %p309_p4 = pnand %p308_p3, %p307_p2 }
  0x19   : > { %p314_p10 = por %p313_p8, %p312_p5 }
  0x1a   : > { %p310_p7 = pneg %p309_p4 }
  0x1c   : > { %p315_p9 = pnand %p314_p10, %p310_p7 }
  0x1e   : > { %318 = shalt.err (!%p315_p9)
}
  0x1f   : > { %261 = dma.hbm_to_vmem [thread:$0]  (!%p477_p13), %s98_s26, 128, %s100_s28, %s88_s30  }
  0x20   : > { %p105_p2 = pnand %p246_p0, %p104_p1 }
  0x21   : > { %s498_s16 = sand.u32 (!%p105_p2), 1, %s392_s7  }
  0x22   : > { %108 = sbr.rel (%p105_p2) target bundleno = 72 (0x48), region = 24  ;;  %s247_s20 = sshll.u32 (!%p105_p2), %s498_s16, 3 }
  0x23   : > { %s111_s21 = scalar_lea.sflag (!%p105_p2), [#allocation3], %s498_s16  ;;  %s114_s22 = scalar_lea.vmem (!%p105_p2), [#allocation2], %s247_s20 }
  0x27   : > { %379 = dma.done.wait (%p455_p6), %s111_s21, 128  }
  0x28   : > { %381 = vsyncadd (%p455_p6), %s111_s21, 4294967168  ;;  %v134_v0 = vld [vmem:[%s114_s22] sm:$0xff]  ;;  %s251_s23 = sshll.u32 %s433_s10, 3  ;;  %s133_s26 = scalar_lea.vmem [#allocation5], %s247_s20 }
  0x29   : > { %v249_v1 = vmul.f32 -1.442695, %v134_v0  ;;  %s166_s17 = scalar_lea.hbm %s540_s1, %s251_s23  ;;  %s168_s27 = sshll.u32 %s133_s26, 4  ;;  %s169_s27 = int_to_ptr.vmem [resolvable:$true] %s168_s27 }
  0x2a   : > { %s170_s28 = sshll.u32 %s166_s17, 4  ;;  %s156_s10 = scalar_lea.sflag [#allocation4], %s498_s16  ;;  %s171_s28 = int_to_ptr.hbm [resolvable:$true] %s170_s28 }
  0x2b   : > { %300 = vpow2.f32 %v249_v1  ;;  %s348_s29 = sshra.s32 %s171_s28, 4  ;;  %s354_s4 = scalar_lea.hbm %s540_s1, 16  ;;  %s349_s29 = int_to_ptr.hbm [resolvable:$true] %s348_s29 }
  0x2c   : > { %s350_s30 = scalar_lea.hbm %s349_s29, 8  ;;  %p355_p0 = scmp.lt.s32.totalorder %s349_s29, %s540_s1 }
  0x2d   : > { %p351_p6 = scmp.ne.s32.totalorder %s349_s29, %s350_s30  ;;  %p356_p1 = scmp.lt.s32.totalorder %s354_s4, %s350_s30 }
  0x2f   : > { %p352_p9 = pnand %p351_p6, %p462_p11  ;;  %p357_p3 = por %p356_p1, %p355_p0 }
  0x31   : > { %v301_v2 = vpop.eup %300  ;;  %p353_p13 = pneg %p352_p9 }
  0x32   : > { %v138_v3 = vadd.f32 1.0, %v301_v2 }
  0x33   : > { %p358_p4 = pnand %p357_p3, %p353_p13 }
  0x34   : > { %302 = vrcp.f32 %v138_v3  ;;  %v150_v6 = vand.u32 2147483648, %v138_v3  ;;  %vm144_vm0 = vweird.f32 %v138_v3  ;;  %v148_v8 = vand.u32 2147483647, %v138_v3 }
  0x36   : > { %v151_v10 = vor.u32 1.1754944e-38, %v150_v6  ;;  %vm149_vm3 = vcmp.eq.f32.partialorder %v148_v8, 8.507059e+37 }
  0x3a   : > { %v303_v4 = vpop.eup %302 }
  0x3b   : > { %v140_v5 = vmul.f32 %v303_v4, %v138_v3  ;;  %vm145_vm1 = vweird.f32 %v303_v4 }
  0x3c   : > { %vm146_vm2 = vmor %vm144_vm0, %vm145_vm1 }
  0x3d   : > { %v141_v7 = vsub.f32 1.0, %v140_v5 }
  0x3f   : > { %v142_v9 = vmul.f32 %v303_v4, %v141_v7 }
  0x41   : > { %v143_v11 = vadd.f32 %v303_v4, %v142_v9 }
  0x43   : > { %v147_v12 = vsel %vm146_vm2, %v303_v4, %v143_v11 }
  0x44   : > { %v152_v13 = vsel %vm149_vm3, %v151_v10, %v147_v12 }
  0x45   : > { %154 = vst [vmem:[%s133_s26] sm:$0xff] %v152_v13 }
  0x46   : > { %361 = shalt.err (!%p358_p4)
}
  0x47   : > { %256 = dma.vmem_to_hbm [thread:$0]  (%p462_p11), %s169_s27, 128, %s171_s28, %s156_s10  }
  0x48 PF: > { %s182_s13 = sand.u32 1, %s388_s6   ;;  %p546_p7 = scmp.ge.s32.totalorder %s400_s9, 2 }
  0x49   : > { %s183_s14 = scalar_lea.sflag [#allocation4], %s182_s13 }
  0x4a   : > { %p263_p5 = pnand %p546_p7, %p466_p12 }
  0x4c   : > { %p264_p8 = pneg %p263_p5 }
  0x4e   : > { %383 = dma.done.wait (%p264_p8), %s183_s14, 128  }
  0x4f   : > { %385 = vsyncadd (%p264_p8), %s183_s14, 4294967168  ;;  %p14_p10 = scmp.ge.s32.totalorder %s437_s12, 4   ;;  %s547_s6 = smov %s392_s7 }
  0x50   : > { %s548_s7 = smov %s396_s8  ;;  %s549_s8 = smov %s449_s15 }
  0x51   : > { %s550_s9 = smov %s437_s12  ;;  %16 = sbr.rel (!%p14_p10) target bundleno = 5 (0x5), region = 69 }
  0x56   :  { %189 = vsyncpa [#allocation3], 1 }
  0x57   :  { %191 = vsyncpa [#allocation3 + $0x1], 1 }
  0x58   :  { %192 = vsyncpa [#allocation4], 1 }
  0x59   :  { %194 = vsyncpa [#allocation4 + $0x1], 1 }

</bundles_post_ra>
